<compile_context>
chip_gen: v6e
topology: v6e:2x2x1
jax: 0.10.0
libtpu: 0.0.40
codegen_flags: <defaults>
</compile_context>

<pallas_src>
import math
import functools

import jax
import jax.numpy as jnp
from jax.experimental import pallas as pl
from jax.experimental.pallas import tpu as pltpu

_PI = 3.14159265  # same constant as the PyTorch reference


def _round_up(n, mult):
    return ((n + mult - 1) // mult) * mult


def _cos_m_theta(c, m):
    # Same polynomial family as SphereProduct.mlambda (Chebyshev polynomials).
    if m == 0:
        return jnp.ones_like(c)
    if m == 1:
        return c
    if m == 2:
        return 2 * c**2 - 1
    if m == 3:
        return 4 * c**3 - 3 * c
    if m == 4:
        return 8 * c**4 - 8 * c**2 + 1
    if m == 5:
        return 16 * c**5 - 20 * c**3 + 5 * c
    raise ValueError("m must be in [0, 5]")


def _row_normalize(x, eps=1e-12):
    """F.normalize semantics: x / max(||x||_2, eps). Returns (normalized, ||x||_2)."""
    xf = x.astype(jnp.float32)
    sumsq = jnp.sum(xf * xf, axis=1, keepdims=True)
    norm = jnp.sqrt(sumsq)
    inv = jax.lax.rsqrt(jnp.maximum(sumsq, eps * eps))  # == 1 / max(norm, eps)
    return xf * inv, norm


def _sphere_kernel(inv_ref, xn_ref, wnt_ref, xnorm_ref, lbl_ref, out_ref, *, m, tile_c):
    """One (TILE_B, TILE_C) output tile of the SphereFace margin product.

    inv_ref   : (1, 1)        f32  SMEM   -- 1 / (1 + lamb), runtime scalar
    xn_ref    : (TILE_B, Dp)  bf16 VMEM   -- row-normalized inputs
    wnt_ref   : (Dp, TILE_C)  bf16 VMEM   -- row-normalized weight, transposed
    xnorm_ref : (TILE_B, 1)   f32  VMEM   -- ||input row||_2
    lbl_ref   : (TILE_B, 1)   i32  VMEM   -- class labels (-1 for padded rows)
    out_ref   : (TILE_B, TILE_C) f32 VMEM
    """
    j = pl.program_id(1)
    inv_one_plus_lamb = inv_ref[0, 0]

    # cos_theta = normalize(x) @ normalize(w).T, on the MXU (bf16 in, f32 accumulate).
    cos_theta = jnp.dot(xn_ref[...], wnt_ref[...],
                        preferred_element_type=jnp.float32)        # (TB, TC)
    cos_theta = jnp.clip(cos_theta, -1.0, 1.0)

    cos_m_theta = _cos_m_theta(cos_theta, m)

    # k = floor(m * acos(cos_theta) / pi).  acos is monotone decreasing on [-1, 1],
    # so the floor is a count of threshold comparisons on cos_theta (no acos needed).
    k = jnp.zeros_like(cos_theta)
    for t in range(1, m + 1):
        k = k + (cos_theta <= math.cos(t * _PI / m)).astype(jnp.float32)

    sign = 1.0 - 2.0 * jnp.mod(k, 2.0)          # (-1)^k for integer-valued float k
    phi_theta = sign * cos_m_theta - 2.0 * k

    # one_hot.scatter_(1, labels, 1): global column index == label.
    tb, tc = cos_theta.shape
    col = jax.lax.broadcasted_iota(jnp.int32, (tb, tc), 1) + j * tile_c
    one_hot = (col == lbl_ref[...]).astype(jnp.float32)

    out = (one_hot * (phi_theta - cos_theta)) * inv_one_plus_lamb + cos_theta
    out_ref[...] = (out * xnorm_ref[...]).astype(out_ref.dtype)


@functools.partial(jax.jit, static_argnames=("m",))
def sphere_product_forward(inputs, weight, labels, inv_one_plus_lamb, *, m):
    """jit'd forward: preprocess (normalize / transpose / pad) + tiled Pallas kernel."""
    B, D = inputs.shape
    C = weight.shape[0]

    # MXU / vreg aligned tiles; lane-dense output (C tile is a multiple of 128).
    tile_b = min(256, _round_up(B, 8))
    tile_c = min(512, _round_up(C, 128))
    b_pad = _round_up(B, tile_b)
    c_pad = _round_up(C, tile_c)
    d_pad = _round_up(D, 128)

    # Hoisted once per step: row-normalize inputs & weight; pre-transpose weight.
    xn, x_norm = _row_normalize(inputs)          # (B, D) f32, (B, 1) f32
    wn, _ = _row_normalize(weight)               # (C, D) f32

    xn_b = jnp.pad(xn.astype(jnp.bfloat16), ((0, b_pad - B), (0, d_pad - D)))
    wnt_b = jnp.pad(wn.astype(jnp.bfloat16).T, ((0, d_pad - D), (0, c_pad - C)))
    x_norm_p = jnp.pad(x_norm, ((0, b_pad - B), (0, 0)))
    lbl_p = jnp.pad(labels.astype(jnp.int32).reshape(B, 1),
                    ((0, b_pad - B), (0, 0)), constant_values=-1)
    inv_arr = jnp.asarray(inv_one_plus_lamb, jnp.float32).reshape(1, 1)

    grid = (b_pad // tile_b, c_pad // tile_c)
    kernel = functools.partial(_sphere_kernel, m=m, tile_c=tile_c)

    out_pad = pl.pallas_call(
        kernel,
        out_shape=jax.ShapeDtypeStruct((b_pad, c_pad), jnp.float32),
        grid=grid,
        in_specs=[
            pl.BlockSpec((1, 1), lambda i, j: (0, 0),
                         memory_space=pltpu.MemorySpace.SMEM),       # 1/(1+lamb)
            pl.BlockSpec((tile_b, d_pad), lambda i, j: (i, 0)),      # xn
            pl.BlockSpec((d_pad, tile_c), lambda i, j: (0, j)),      # wn^T (streamed)
            pl.BlockSpec((tile_b, 1), lambda i, j: (i, 0)),          # ||x||
            pl.BlockSpec((tile_b, 1), lambda i, j: (i, 0)),          # labels
        ],
        out_specs=pl.BlockSpec((tile_b, tile_c), lambda i, j: (i, j)),
        compiler_params=pltpu.CompilerParams(
            dimension_semantics=("parallel", "parallel"),
            vmem_limit_bytes=32 * 1024 * 1024,
        ),
    )(inv_arr, xn_b, wnt_b, x_norm_p, lbl_p)

    return out_pad[:B, :C]


class SphereProductPallas:
    """JAX/Pallas port of SphereProduct (stateful lambda schedule kept host-side,
    exactly as in the PyTorch module)."""

    def __init__(self, in_features, out_features, m=4, key=None):
        self.in_features = in_features
        self.out_features = out_features
        self.m = m
        self.base = 1000.0
        self.gamma = 0.12
        self.power = 1
        self.LambdaMin = 5.0
        self.iter = 0
        if key is None:
            key = jax.random.PRNGKey(0)
        # xavier_uniform_: U(-a, a), a = sqrt(6 / (fan_in + fan_out))
        bound = math.sqrt(6.0 / (in_features + out_features))
        self.weight = jax.random.uniform(
            key, (out_features, in_features), dtype=jnp.float32,
            minval=-bound, maxval=bound)

    def __call__(self, inputs, labels):
        self.iter += 1
        lamb = max(self.LambdaMin,
                   self.base * (1 + self.gamma * self.iter) ** (-1 * self.power))
        inv = jnp.float32(1.0 / (1.0 + lamb))          # runtime scalar, no recompile
        return sphere_product_forward(inputs, self.weight, labels, inv, m=self.m)


def _reference(inputs, weight, labels, m, lamb):
    """Pure-JAX reference mirroring the PyTorch forward (same bf16 matmul-input
    precision path as the kernel, acos/floor for k)."""
    xn, x_norm = _row_normalize(inputs)
    wn, _ = _row_normalize(weight)
    xn = xn.astype(jnp.bfloat16).astype(jnp.float32)
    wn = wn.astype(jnp.bfloat16).astype(jnp.float32)
    cos_theta = jnp.clip(xn @ wn.T, -1.0, 1.0)
    cos_m_theta = _cos_m_theta(cos_theta, m)
    theta = jnp.arccos(cos_theta)
    k = jnp.floor(m * theta / _PI)
    phi_theta = (-1.0) ** k * cos_m_theta - 2.0 * k
    one_hot = jax.nn.one_hot(labels, weight.shape[0], dtype=jnp.float32)
    out = one_hot * (phi_theta - cos_theta) / (1.0 + lamb) + cos_theta
    return out * x_norm


if __name__ == "__main__":
    def check(B, D, C, m, key, tag):
        k_x, k_lbl, k_w = jax.random.split(key, 3)
        inputs = jax.random.normal(k_x, (B, D), dtype=jnp.float32)
        labels = jax.random.randint(k_lbl, (B,), 0, C, dtype=jnp.int32)
        layer = SphereProductPallas(D, C, m=m, key=k_w)
        out = jax.block_until_ready(layer(inputs, labels))
        lamb = max(layer.LambdaMin,
                   layer.base * (1 + layer.gamma * layer.iter) ** (-layer.power))
        ref = _reference(inputs, layer.weight, labels, m, lamb)
        assert out.shape == (B, C), f"{tag}: bad shape {out.shape}"
        assert jnp.allclose(out, ref, atol=1e-2, rtol=1e-2), f"{tag}: mismatch vs reference"

    key = jax.random.PRNGKey(0)
    k1, k2 = jax.random.split(key)
    # Small demo shape (matches the original toy test).
    check(B=8, D=32, C=16, m=4, key=k1, tag="small")
    # Exercises D/C padding, the multi C-tile grid, and the global one-hot column offset.
    check(B=24, D=72, C=640, m=3, key=k2, tag="tiled")

    print("KERNEL_OK")
</pallas_src>

<mosaic_0001>
module attributes {stable_mosaic.version = 11 : i64} {
  func.func @_sphere_kernel(%arg0: i32, %arg1: i32, %arg2: memref<1x1xf32, #tpu.memory_space<smem>>, %arg3: memref<8x128xbf16, #tpu.memory_space<vmem>>, %arg4: memref<128x128xbf16, #tpu.memory_space<vmem>>, %arg5: memref<8x1xf32, #tpu.memory_space<vmem>>, %arg6: memref<8x1xi32, #tpu.memory_space<vmem>>, %arg7: memref<8x128xf32, #tpu.memory_space<vmem>>) attributes {dimension_semantics = [#tpu.dimension_semantics<parallel>, #tpu.dimension_semantics<parallel>], iteration_bounds = array<i64: 1, 1>, scalar_prefetch = 0 : i64, scratch_operands = 0 : i64, tpu.core_type = #tpu.core_type<tc>, window_params = [{transform_indices = @transform_0, window_bounds = array<i64: 1, 1>}, {transform_indices = @transform_1, window_bounds = array<i64: 8, 128>}, {transform_indices = @transform_2, window_bounds = array<i64: 128, 128>}, {transform_indices = @transform_3, window_bounds = array<i64: 8, 1>}, {transform_indices = @transform_4, window_bounds = array<i64: 8, 1>}, {transform_indices = @transform_5, window_bounds = array<i64: 8, 128>}]} {
    %c0 = arith.constant 0 : index
    %c0_0 = arith.constant 0 : index
    %0 = memref.load %arg2[%c0, %c0_0] : memref<1x1xf32, #tpu.memory_space<smem>>
    %c0_1 = arith.constant 0 : index
    %c0_2 = arith.constant 0 : index
    %1 = vector.load %arg3[%c0_1, %c0_2] : memref<8x128xbf16, #tpu.memory_space<vmem>>, vector<8x128xbf16>
    %c0_3 = arith.constant 0 : index
    %c0_4 = arith.constant 0 : index
    %2 = vector.load %arg4[%c0_3, %c0_4] : memref<128x128xbf16, #tpu.memory_space<vmem>>, vector<128x128xbf16>
    %cst = arith.constant dense<0.000000e+00> : vector<8x128xf32>
    %3 = tpu.matmul %1, %2, %cst {dimension_numbers = #tpu.dot_dimension_numbers<[1], [0], [0], [1], [0, 0, 1, 1], [], []>} : vector<8x128xbf16>, vector<128x128xbf16>, vector<8x128xf32> -> vector<8x128xf32>
    %cst_5 = arith.constant -1.000000e+00 : f32
    %cst_6 = arith.constant 1.000000e+00 : f32
    %4 = vector.broadcast %cst_5 : f32 to vector<8x128xf32>
    %5 = arith.maximumf %4, %3 : vector<8x128xf32>
    %6 = vector.broadcast %cst_6 : f32 to vector<8x128xf32>
    %7 = arith.minimumf %6, %5 : vector<8x128xf32>
    %8 = arith.mulf %7, %7 : vector<8x128xf32>
    %9 = arith.mulf %8, %8 : vector<8x128xf32>
    %cst_7 = arith.constant 8.000000e+00 : f32
    %10 = vector.broadcast %cst_7 : f32 to vector<8x128xf32>
    %11 = arith.mulf %10, %9 : vector<8x128xf32>
    %12 = arith.mulf %7, %7 : vector<8x128xf32>
    %cst_8 = arith.constant 8.000000e+00 : f32
    %13 = vector.broadcast %cst_8 : f32 to vector<8x128xf32>
    %14 = arith.mulf %13, %12 : vector<8x128xf32>
    %15 = arith.subf %11, %14 : vector<8x128xf32>
    %cst_9 = arith.constant 1.000000e+00 : f32
    %16 = vector.broadcast %cst_9 : f32 to vector<8x128xf32>
    %17 = arith.addf %15, %16 : vector<8x128xf32>
    %cst_10 = arith.constant 0.000000e+00 : f32
    %18 = vector.broadcast %cst_10 : f32 to vector<8x128xf32>
    %cst_11 = arith.constant 0.707106769 : f32
    %19 = vector.broadcast %cst_11 : f32 to vector<8x128xf32>
    %20 = arith.cmpf ole, %7, %19 : vector<8x128xf32>
    %21 = arith.extui %20 : vector<8x128xi1> to vector<8x128xi32>
    %22 = arith.sitofp %21 : vector<8x128xi32> to vector<8x128xf32>
    %23 = arith.addf %18, %22 : vector<8x128xf32>
    %cst_12 = arith.constant 1.79489656E-9 : f32
    %24 = vector.broadcast %cst_12 : f32 to vector<8x128xf32>
    %25 = arith.cmpf ole, %7, %24 : vector<8x128xf32>
    %26 = arith.extui %25 : vector<8x128xi1> to vector<8x128xi32>
    %27 = arith.sitofp %26 : vector<8x128xi32> to vector<8x128xf32>
    %28 = arith.addf %23, %27 : vector<8x128xf32>
    %cst_13 = arith.constant -0.707106769 : f32
    %29 = vector.broadcast %cst_13 : f32 to vector<8x128xf32>
    %30 = arith.cmpf ole, %7, %29 : vector<8x128xf32>
    %31 = arith.extui %30 : vector<8x128xi1> to vector<8x128xi32>
    %32 = arith.sitofp %31 : vector<8x128xi32> to vector<8x128xf32>
    %33 = arith.addf %28, %32 : vector<8x128xf32>
    %cst_14 = arith.constant -1.000000e+00 : f32
    %34 = vector.broadcast %cst_14 : f32 to vector<8x128xf32>
    %35 = arith.cmpf ole, %7, %34 : vector<8x128xf32>
    %36 = arith.extui %35 : vector<8x128xi1> to vector<8x128xi32>
    %37 = arith.sitofp %36 : vector<8x128xi32> to vector<8x128xf32>
    %38 = arith.addf %33, %37 : vector<8x128xf32>
    %cst_15 = arith.constant 2.000000e+00 : f32
    %39 = vector.broadcast %cst_15 : f32 to vector<8x128xf32>
    %40 = arith.remf %38, %39 : vector<8x128xf32>
    %cst_16 = arith.constant 0.000000e+00 : f32
    %41 = vector.broadcast %cst_16 : f32 to vector<8x128xf32>
    %42 = arith.cmpf one, %40, %41 : vector<8x128xf32>
    %cst_17 = arith.constant 0.000000e+00 : f32
    %43 = vector.broadcast %cst_17 : f32 to vector<8x128xf32>
    %44 = arith.cmpf olt, %40, %43 : vector<8x128xf32>
    %cst_18 = arith.constant 0.000000e+00 : f32
    %45 = arith.cmpf olt, %cst_15, %cst_18 : f32
    %46 = vector.broadcast %45 : i1 to vector<8x128xi1>
    %47 = vector.broadcast %46 : vector<8x128xi1> to vector<8x128xi1>
    %48 = arith.xori %44, %47 : vector<8x128xi1>
    %49 = arith.andi %48, %42 : vector<8x128xi1>
    %50 = vector.broadcast %cst_15 : f32 to vector<8x128xf32>
    %51 = arith.addf %40, %50 : vector<8x128xf32>
    %52 = arith.select %49, %51, %40 : vector<8x128xi1>, vector<8x128xf32>
    %cst_19 = arith.constant 2.000000e+00 : f32
    %53 = vector.broadcast %cst_19 : f32 to vector<8x128xf32>
    %54 = arith.mulf %53, %52 : vector<8x128xf32>
    %cst_20 = arith.constant 1.000000e+00 : f32
    %55 = vector.broadcast %cst_20 : f32 to vector<8x128xf32>
    %56 = arith.subf %55, %54 : vector<8x128xf32>
    %57 = arith.mulf %56, %17 : vector<8x128xf32>
    %cst_21 = arith.constant 2.000000e+00 : f32
    %58 = vector.broadcast %cst_21 : f32 to vector<8x128xf32>
    %59 = arith.mulf %58, %38 : vector<8x128xf32>
    %60 = arith.subf %57, %59 : vector<8x128xf32>
    %61 = tpu.iota {dimensions = array<i32: 1>} : vector<8x128xi32>
    %c128_i32 = arith.constant 128 : i32
    %62 = arith.muli %arg1, %c128_i32 : i32
    %63 = vector.broadcast %62 : i32 to vector<8x128xi32>
    %64 = arith.addi %61, %63 : vector<8x128xi32>
    %c0_22 = arith.constant 0 : index
    %c0_23 = arith.constant 0 : index
    %65 = vector.load %arg6[%c0_22, %c0_23] : memref<8x1xi32, #tpu.memory_space<vmem>>, vector<8x1xi32>
    %66 = vector.broadcast %65 : vector<8x1xi32> to vector<8x128xi32>
    %67 = arith.cmpi eq, %64, %66 : vector<8x128xi32>
    %68 = arith.extui %67 : vector<8x128xi1> to vector<8x128xi32>
    %69 = arith.sitofp %68 : vector<8x128xi32> to vector<8x128xf32>
    %70 = arith.subf %60, %7 : vector<8x128xf32>
    %71 = arith.mulf %69, %70 : vector<8x128xf32>
    %72 = vector.broadcast %0 : f32 to vector<8x128xf32>
    %73 = arith.mulf %71, %72 : vector<8x128xf32>
    %74 = arith.addf %73, %7 : vector<8x128xf32>
    %c0_24 = arith.constant 0 : index
    %c0_25 = arith.constant 0 : index
    %75 = vector.load %arg5[%c0_24, %c0_25] : memref<8x1xf32, #tpu.memory_space<vmem>>, vector<8x1xf32>
    %76 = vector.broadcast %75 : vector<8x1xf32> to vector<8x128xf32>
    %77 = arith.mulf %74, %76 : vector<8x128xf32>
    %c0_26 = arith.constant 0 : index
    %c0_27 = arith.constant 0 : index
    %78 = vector.load %arg7[%c0_26, %c0_27] : memref<8x128xf32, #tpu.memory_space<vmem>>, vector<8x128xf32>
    tpu.vector_store %arg7[%c0_26, %c0_27], %77 {strides = array<i32>} : memref<8x128xf32, #tpu.memory_space<vmem>>, vector<8x128xf32>,
    return
  }
  func.func @transform_0(%arg0: i32, %arg1: i32) -> (i32, i32) {
    %c0_i32 = arith.constant 0 : i32
    %c0_i32_0 = arith.constant 0 : i32
    %c0_i32_1 = arith.constant 0 : i32
    return %c0_i32, %c0_i32_0 : i32, i32
  }
  func.func @transform_1(%arg0: i32, %arg1: i32) -> (i32, i32) {
    %c0_i32 = arith.constant 0 : i32
    %c0_i32_0 = arith.constant 0 : i32
    return %arg0, %c0_i32 : i32, i32
  }
  func.func @transform_2(%arg0: i32, %arg1: i32) -> (i32, i32) {
    %c0_i32 = arith.constant 0 : i32
    %c0_i32_0 = arith.constant 0 : i32
    return %c0_i32, %arg1 : i32, i32
  }
  func.func @transform_3(%arg0: i32, %arg1: i32) -> (i32, i32) {
    %c0_i32 = arith.constant 0 : i32
    %c0_i32_0 = arith.constant 0 : i32
    return %arg0, %c0_i32 : i32, i32
  }
  func.func @transform_4(%arg0: i32, %arg1: i32) -> (i32, i32) {
    %c0_i32 = arith.constant 0 : i32
    %c0_i32_0 = arith.constant 0 : i32
    return %arg0, %c0_i32 : i32, i32
  }
  func.func @transform_5(%arg0: i32, %arg1: i32) -> (i32, i32) {
    %c0_i32 = arith.constant 0 : i32
    return %arg0, %arg1 : i32, i32
  }
}

</mosaic_0001>

<bundles_post_ra>
// kernel: sphere_product_forward.1
= control target key start
LH: loop header
LB: loop body
LE: loop exit
PB: predicated region body
PF: predicated region fallthrough
CT: control target
= control target key end

     0   :  { %v291_v1 = vmov 0.0   ;;  %vm292_vm0 = vmmov 0   ;;  %v293_v3 = vmov 0   ;;  %s378_s0 = inlined_call_operand.<no memory space> [shape: f32[1,1], index: 0, kind: input, shape index: {}]   ;;  %s379_s1 = inlined_call_operand.vmem [shape: bf16[8,128], index: 1, kind: input, shape index: {}]   ;;  %s380_s2 = inlined_call_operand.vmem [shape: bf16[128,128], index: 2, kind: input, shape index: {}]   ;;  %s381_s3 = inlined_call_operand.vmem [shape: f32[8,1], index: 3, kind: input, shape index: {}]   ;;  %s382_s4 = inlined_call_operand.vmem [shape: s32[8,1], index: 4, kind: input, shape index: {}]   ;;  %s383_s5 = inlined_call_operand.hbm [shape: f32[8,128], index: 5, kind: output, shape index: {}]  }
   0x1   :  { %v261_v0 = vld [vmem:[%s380_s2 + $0x38] sm:$0xff]   ;;  %236 = vmatprep.subr.bf16.mxu0 %v291_v1  ;;  %v262_v2 = vld [vmem:[%s380_s2 + $0x30] sm:$0xff]   ;;  %252 = vmatprep.mubr.msk.bf16.mxu0 %vm292_vm0, %v291_v1  ;;  %v263_v4 = vld [vmem:[%s380_s2 + $0x28] sm:$0xff]  }
   0x2   :  { %237 = vmatpush3.bf16.msra.mxu0 %v261_v0  ;;  %260 = vset.pattern.permute.xlu0 %v293_v3  ;;  %v179_v5 = vld [vmem:[%s382_s4] sm:$0xff] }
   0x3   :  { %238 = vmatprep.subr.bf16.mxu0 %v291_v1  ;;  %181 = vperm.xlu0 %260, %v179_v5  }
   0x6   :  { %239 = vmatpush3.bf16.msra.mxu0 %v262_v2 }
   0x7   :  { %240 = vmatprep.subr.bf16.mxu0 %v291_v1 }
   0x8   :  { %11 = vsyncpa [#allocation4], 0  ;;  %v264_v6 = vld [vmem:[%s380_s2 + $0x20] sm:$0xff]   ;;  %v265_v8 = vld [vmem:[%s380_s2 + $0x18] sm:$0xff]   ;;  %v174_v38 = vlaneseq  ;;  %v188_v52 = vstv %s378_s0  ;;  %s294_s13 = smov [#allocation3]  }
   0x9   :  { %v191_v7 = vld [vmem:[%s381_s3] sm:$0xff]  ;;  %v266_v9 = vld [vmem:[%s380_s2 + $0x10] sm:$0xff]   ;;  %v267_v10 = vld [vmem:[%s380_s2 + $0x8] sm:$0xff]   ;;  %s205_s14 = sshll.u32 %s294_s13, 4  ;;  %s206_s14 = int_to_ptr.vmem [resolvable:$true] %s205_s14 }
   0xa   :  { %241 = vmatpush3.bf16.msra.mxu0 %v263_v4  ;;  %194 = vperm.xlu0 %260, %v191_v7   ;;  %v268_v11 = vld [vmem:[%s380_s2] sm:$0xff]   ;;  %v175_v43 = vand.u32 127, %v174_v38  ;;  %s269_s15 = scalar_lea.vmem %s206_s14, 128  ;;  %p274_p1 = scmp.lt.s32.totalorder %s206_s14, %s206_s14 }
   0xb   :  { %242 = vmatprep.subr.bf16.mxu0 %v291_v1  ;;  %v24_v12 = vld [vmem:[%s379_s1] sm:$0xf]  ;;  %p270_p0 = scmp.ne.s32.totalorder %s206_s14, %s269_s15  ;;  %p275_p2 = scmp.lt.s32.totalorder %s269_s15, %s269_s15 }
   0xd   :  { %p276_p3 = por %p275_p2, %p274_p1 }
   0xe   :  { %243 = vmatpush3.bf16.msra.mxu0 %v264_v6 }
   0xf   :  { %244 = vmatprep.subr.bf16.mxu0 %v291_v1  ;;  %p277_p4 = pnand %p276_p3, %p270_p0 }
  0x12   :  { %245 = vmatpush3.bf16.msra.mxu0 %v265_v8 }
  0x13   :  { %246 = vmatprep.subr.bf16.mxu0 %v291_v1 }
  0x16   :  { %247 = vmatpush3.bf16.msra.mxu0 %v266_v9 }
  0x17   :  { %248 = vmatprep.subr.bf16.mxu0 %v291_v1 }
  0x1a   :  { %249 = vmatpush3.bf16.msra.mxu0 %v267_v10 }
  0x1b   :  { %250 = vmatprep.subr.bf16.mxu0 %v291_v1 }
  0x1e   :  { %251 = vmatpush3.bf16.msra.mxu0 %v268_v11 }
  0x21   :  { %253 = vmatmul.mubr.bf16.vlgmr.msra.gmra.mxu0 %v24_v12 }
  0x7e   :  { %v182_v46 = vpop.permute.xlu0 %181 }
  0x7f   :  { %vm183_vm9 = vcmp.eq.s32.totalorder %v175_v43, %v182_v46 }
  0x80   :  { %v226_v50 = vsel %vm183_vm9, 1.0, %v291_v1 }
  0x85   :  { %v195_v56 = vpop.permute.xlu0 %194 }
  0xe1   :  { %v123_v13 = vpop.f32.mrf.mxu0 }
  0xe2   :  { %v221_v14 = vclamps-f32 %v123_v13, 1.0 }
  0xe3   :  { %v254_v15 = vpop.f32.mrf.mxu0 }
  0xe4   :  { %vm137_vm1 = vcmp.le.f32.partialorder %v221_v14, 0.70710677  ;;  %vm141_vm2 = vcmp.le.f32.partialorder %v221_v14, 1.7948966e-09  ;;  %vm145_vm3 = vcmp.le.f32.partialorder %v221_v14, -0.70710677  ;;  %v131_v28 = vmul.f32 %v221_v14, %v221_v14 }
  0xe5   :  { %v126_v16 = vpop.f32.mrf.mxu0  ;;  %v222_v17 = vsel %vm137_vm1, 1.0, %v291_v1  ;;  %v223_v18 = vsel %vm141_vm2, 1.0, %v291_v1  ;;  %vm149_vm4 = vcmp.le.f32.partialorder %v221_v14, -1.0  ;;  %v224_v21 = vsel %vm145_vm3, 1.0, %v291_v1 }
  0xe6   :  { %v144_v19 = vadd.f32 %v223_v18, %v222_v17  ;;  %v225_v23 = vsel %vm149_vm4, 1.0, %v291_v1  ;;  %v132_v31 = vmul.f32 %v131_v28, %v131_v28  ;;  %v134_v37 = vmul.f32 8.0, %v131_v28 }
  0xe7   :  { %v255_v20 = vpop.f32.mrf.mxu0 }
  0xe8   :  { %v148_v22 = vadd.f32 %v224_v21, %v144_v19  ;;  %v133_v35 = vmul.f32 8.0, %v132_v31 }
  0xea   :  { %v152_v24 = vadd.f32 %v225_v23, %v148_v22  ;;  %v135_v40 = vsub.f32 %v133_v35, %v134_v37 }
  0xec   :  { %v153_v25 = vand.u32 2147483647, %v152_v24  ;;  %v162_v34 = vand.u32 2147483648, %v152_v24  ;;  %v136_v44 = vadd.f32 1.0, %v135_v40  ;;  %v172_v48 = vmul.f32 2.0, %v152_v24 }
  0xee   :  { %v155_v26 = vmul.f32 0.5, %v153_v25 }
  0xf0   :  { %v156_v27 = vfloor.f32 %v155_v26 }
  0xf2   :  { %v157_v29 = vmul.f32 2.0, %v156_v27 }
  0xf4   :  { %v158_v30 = vsub.f32 %v153_v25, %v157_v29 }
  0xf6   :  { %vm159_vm5 = vcmp.eq.f32.partialorder %v158_v30, 2.0 }
  0xf7   :  { %v160_v32 = vsel %vm159_vm5, 0.0, %v158_v30 }
  0xf8   :  { %v161_v33 = vand.u32 2147483647, %v160_v32 }
  0xfa   :  { %v163_v36 = vor.u32 %v162_v34, %v161_v33 }
  0xfc   :  { %vm164_vm6 = vcmp.ne.f32.partialorder %v163_v36, 0.0  ;;  %vm165_vm7 = vcmp.lt.f32.partialorder %v163_v36, 0.0  ;;  %v167_v39 = vadd.f32 2.0, %v163_v36 }
  0xfd   :  { %vm166_vm8 = vmand %vm165_vm7, %vm164_vm6 }
  0xfe   :  { %v168_v41 = vsel %vm166_vm8, %v167_v39, %v163_v36 }
  0xff   :  { %v169_v42 = vmul.f32 2.0, %v168_v41 }
 0x101   :  { %v170_v45 = vsub.f32 1.0, %v169_v42 }
 0x103   :  { %v171_v47 = vmul.f32 %v170_v45, %v136_v44 }
 0x105   :  { %v173_v49 = vsub.f32 %v171_v47, %v172_v48 }
 0x107   :  { %v186_v51 = vsub.f32 %v173_v49, %v221_v14 }
 0x109   :  { %v187_v53 = vmul.f32 %v226_v50, %v186_v51 }
 0x10b   :  { %v189_v54 = vmul.f32 %v188_v52, %v187_v53 }
 0x10d   :  { %v190_v55 = vadd.f32 %v221_v14, %v189_v54 }
 0x10f   :  { %v197_v57 = vmul.f32 %v195_v56, %v190_v55 }
 0x111   :  { %198 = vst [vmem:[#allocation3] sm:$0xff] %v197_v57 }
 0x112   :  { %280 = shalt.err (!%p277_p4)
}
 0x113   :  { %208 = dma.vmem_to_hbm [thread:$0]  %s206_s14, 128, %s383_s5, [#allocation4]  }
 0x114   :  { %289 = dma.done.wait [#allocation4], 128  }
 0x115   :  { %290 = vsyncadd [#allocation4], 4294967168 }
 0x116   :  { %212 = vsyncpa [#allocation4], 1 }

</bundles_post_ra>
